<compile_context>
chip_gen: v5e
topology: v5e:2x2
jax: 0.10.0
libtpu: 0.0.40
codegen_flags: <defaults>
</compile_context>

<pallas_src>
import functools

import jax
import jax.numpy as jnp
from jax.experimental import pallas as pl
from jax.experimental.pallas import tpu as pltpu

LANES = 128
DEFAULT_ROWS_PER_TILE = 8192          # (8192, 128) f32 block = 4 MiB / input / buffer
VMEM_LIMIT_BYTES = 32 * 1024 * 1024   # raise v5e's 16 MiB default; <= physical on all chips


def _round_up(x, m):
    return ((x + m - 1) // m) * m


def _sublane_multiple(dtype):
    # Native sublane packing: 4-byte -> 8, 2-byte -> 16, 1-byte -> 32.
    itemsize = jnp.dtype(dtype).itemsize
    return 8 * max(1, 4 // max(1, itemsize))


def _num_tensorcores():
    # Only v7x has 2 TensorCores per chip; default defensively to 1.
    try:
        dev = jax.devices()[0]
        if dev.platform != "tpu":
            return 1
        kind = (getattr(dev, "device_kind", "") or "").lower()
        return 2 if "v7" in kind else 1
    except Exception:
        return 1


def _msle_kernel(pred_ref, true_ref, out_ref, acc_ref, *,
                 rows_per_tile, steps_per_core, n_rows, acc_rows, need_mask):
    """Per-core partial sum of (log1p(pred) - log1p(true))^2 over row tiles."""
    s = pl.program_id(1)

    @pl.when(s == 0)
    def _():
        acc_ref[...] = jnp.zeros_like(acc_ref)

    # Read in native dtype, compute in f32.
    p = pred_ref[...].astype(jnp.float32)
    t = true_ref[...].astype(jnp.float32)
    d = jnp.log1p(p) - jnp.log1p(t)
    sq = d * d

    def _accumulate(vals):
        # Per-step reduce into a small accumulator (pure VPU vreg adds); avoids
        # a tile-sized VMEM read+write of the accumulator every step.
        acc_ref[...] += jnp.sum(vals.reshape(-1, acc_rows, LANES), axis=0)

    if need_mask:
        c = pl.program_id(0)
        block_start = (c * steps_per_core + s) * rows_per_tile
        is_full = block_start + rows_per_tile <= n_rows

        @pl.when(is_full)
        def _():
            _accumulate(sq)

        @pl.when(jnp.logical_not(is_full))
        def _():
            # Ragged last block / clamped fully-out-of-range blocks. Must be a
            # select (not multiply): overhang rows may contain NaN/Inf.
            row_ids = block_start + jax.lax.broadcasted_iota(
                jnp.int32, sq.shape, 0)
            _accumulate(jnp.where(row_ids < n_rows, sq, jnp.float32(0.0)))
    else:
        _accumulate(sq)

    @pl.when(s == pl.num_programs(1) - 1)
    def _():
        # Single sublane reduce per core at finalize -> (1, 128) lane partials.
        out_ref[...] = jnp.sum(acc_ref[...], axis=0, keepdims=True)


def msle_loss(pred, true, rows_per_tile=DEFAULT_ROWS_PER_TILE):
    """MSLE loss == torch.mean((log1p(pred) - log1p(true)) ** 2)."""
    assert pred.shape == true.shape, "pred/true must have identical shapes"
    assert pred.dtype == true.dtype, "pred/true must have identical dtypes"
    n = int(pred.size)
    assert n > 0

    pred_f = jnp.ravel(pred)   # no dtype cast; free reshape for contiguous inputs
    true_f = jnp.ravel(true)

    # Only the lane remainder (n % 128) ever needs padding; padded zeros
    # contribute exactly 0 (log1p(0) - log1p(0) = 0). Row-level raggedness is
    # handled in-kernel without any copy.
    # TODO(synk): fully copy-free handling of n % 128 != 0 (manual DMA / 1-D
    # blocks with flat-index masking) if that case ever matters.
    pad = (-n) % LANES
    if pad:
        pred_f = jnp.pad(pred_f, (0, pad))
        true_f = jnp.pad(true_f, (0, pad))

    rows = (n + pad) // LANES
    sub = _sublane_multiple(pred.dtype)
    rows_per_tile = min(int(rows_per_tile), _round_up(rows, sub))
    rows_per_tile = _round_up(rows_per_tile, sub)
    # Small accumulator: 64 rows for summation headroom when the tile allows.
    acc_rows = 64 if rows_per_tile % 64 == 0 else sub

    pred2d = pred_f.reshape(rows, LANES)   # free reshape (contiguous)
    true2d = true_f.reshape(rows, LANES)

    total_steps = pl.cdiv(rows, rows_per_tile)
    ncores = _num_tensorcores()
    ncores = ncores if total_steps >= ncores else 1
    steps_per_core = pl.cdiv(total_steps, ncores)
    # Masking needed iff the rectangular (ncores x steps_per_core) grid covers
    # more rows than exist (ragged tail or duplicated clamped block).
    need_mask = (ncores * steps_per_core * rows_per_tile) != rows
    last_block = total_steps - 1

    def in_index_map(c, s):
        # Clamp so a fully out-of-range logical block re-reads the last valid
        # block (its contribution is zeroed by the in-kernel mask).
        return (jnp.minimum(c * steps_per_core + s, last_block), 0)

    kernel = functools.partial(
        _msle_kernel,
        rows_per_tile=rows_per_tile,
        steps_per_core=steps_per_core,
        n_rows=rows,
        acc_rows=acc_rows,
        need_mask=need_mask,
    )

    partials = pl.pallas_call(
        kernel,
        out_shape=jax.ShapeDtypeStruct((1, ncores * LANES), jnp.float32),
        grid_spec=pltpu.PrefetchScalarGridSpec(
            num_scalar_prefetch=0,
            grid=(ncores, steps_per_core),
            in_specs=[
                pl.BlockSpec((rows_per_tile, LANES), in_index_map),
                pl.BlockSpec((rows_per_tile, LANES), in_index_map),
            ],
            # Each core owns its own 128-lane column of the (1, ncores*128) out.
            out_specs=pl.BlockSpec((1, LANES), lambda c, s: (0, c)),
            scratch_shapes=[pltpu.VMEM((acc_rows, LANES), jnp.float32)],
        ),
        compiler_params=pltpu.CompilerParams(
            # TODO(synk): on v7x, verify in xprof that the leading "parallel"
            # axis actually shards across both TensorCores (else CORE_PARALLEL
            # / pl.core_map over create_tensorcore_mesh).
            dimension_semantics=("parallel", "arbitrary"),
            vmem_limit_bytes=VMEM_LIMIT_BYTES,
        ),
    )(pred2d, true2d)

    # Tiny final cross-lane reduce + mean in plain JAX.
    return jnp.sum(partials) / jnp.float32(n)


if __name__ == "__main__":
    key = jax.random.PRNGKey(0)
    k1, k2, k3, k4 = jax.random.split(key, 4)

    # Small NCHW-shaped inputs (non-negative, as expected for a log1p loss).
    shape = (2, 4, 16, 16)
    pred = jax.random.uniform(k1, shape, dtype=jnp.float32) * 3.0
    true = jax.random.uniform(k2, shape, dtype=jnp.float32) * 3.0

    loss = jax.block_until_ready(msle_loss(pred, true))
    ref = jnp.mean((jnp.log1p(pred) - jnp.log1p(true)) ** 2)
    assert jnp.allclose(loss, ref, rtol=1e-5, atol=1e-6), (loss, ref)

    # Second check exercising multi-step accumulation + the ragged-block mask
    # (24 rows with a 16-row tile -> 2 steps, last block partial).
    shape2 = (3, 8, 128)
    pred2 = jax.random.uniform(k3, shape2, dtype=jnp.float32) * 3.0
    true2 = jax.random.uniform(k4, shape2, dtype=jnp.float32) * 3.0
    loss2 = jax.block_until_ready(msle_loss(pred2, true2, rows_per_tile=16))
    ref2 = jnp.mean((jnp.log1p(pred2) - jnp.log1p(true2)) ** 2)
    assert jnp.allclose(loss2, ref2, rtol=1e-5, atol=1e-6), (loss2, ref2)

    print("KERNEL_OK")
</pallas_src>

<mosaic_0001>
module attributes {stable_mosaic.version = 11 : i64} {
  func.func @_msle_kernel(%arg0: i32, %arg1: i32, %arg2: memref<16x128xf32, #tpu.memory_space<vmem>>, %arg3: memref<16x128xf32, #tpu.memory_space<vmem>>, %arg4: memref<1x128xf32, #tpu.memory_space<vmem>>, %arg5: memref<8x128xf32, #tpu.memory_space<vmem>>) attributes {dimension_semantics = [#tpu.dimension_semantics<parallel>, #tpu.dimension_semantics<arbitrary>], iteration_bounds = array<i64: 1, 1>, scalar_prefetch = 0 : i64, scratch_operands = 1 : i64, tpu.core_type = #tpu.core_type<tc>, window_params = [{transform_indices = @transform_0, window_bounds = array<i64: 16, 128>}, {transform_indices = @transform_1, window_bounds = array<i64: 16, 128>}, {transform_indices = @transform_2, window_bounds = array<i64: 1, 128>}]} {
    %c0_i32 = arith.constant 0 : i32
    %0 = arith.cmpi eq, %arg1, %c0_i32 : i32
    %1 = arith.extui %0 : i1 to i32
    %c0_i32_0 = arith.constant 0 : i32
    %2 = arith.cmpi ne, %1, %c0_i32_0 : i32
    scf.if %2 {
      %cst_10 = arith.constant 0.000000e+00 : f32
      %17 = vector.broadcast %cst_10 : f32 to vector<8x128xf32>
      %c0_11 = arith.constant 0 : index
      %c0_12 = arith.constant 0 : index
      %18 = vector.load %arg5[%c0_11, %c0_12] : memref<8x128xf32, #tpu.memory_space<vmem>>, vector<8x128xf32>
      tpu.vector_store %arg5[%c0_11, %c0_12], %17 {strides = array<i32>} : memref<8x128xf32, #tpu.memory_space<vmem>>, vector<8x128xf32>,
    } else {
    }
    %c0 = arith.constant 0 : index
    %c0_1 = arith.constant 0 : index
    %3 = vector.load %arg2[%c0, %c0_1] : memref<16x128xf32, #tpu.memory_space<vmem>>, vector<16x128xf32>
    %c0_2 = arith.constant 0 : index
    %c0_3 = arith.constant 0 : index
    %4 = vector.load %arg3[%c0_2, %c0_3] : memref<16x128xf32, #tpu.memory_space<vmem>>, vector<16x128xf32>
    %5 = math.log1p %3 : vector<16x128xf32>
    %6 = math.log1p %4 : vector<16x128xf32>
    %7 = arith.subf %5, %6 : vector<16x128xf32>
    %8 = arith.mulf %7, %7 : vector<16x128xf32>
    %c0_4 = arith.constant 0 : index
    %c0_5 = arith.constant 0 : index
    %9 = vector.load %arg5[%c0_4, %c0_5] : memref<8x128xf32, #tpu.memory_space<vmem>>, vector<8x128xf32>
    %10 = vector.shape_cast %8 : vector<16x128xf32> to vector<2x8x128xf32>
    %cst = arith.constant dense<0.000000e+00> : vector<8x128xf32>
    %11 = vector.multi_reduction <add>, %10, %cst [0] : vector<2x8x128xf32> to vector<8x128xf32>
    %12 = arith.addf %9, %11 : vector<8x128xf32>
    %c0_6 = arith.constant 0 : index
    %c0_7 = arith.constant 0 : index
    %13 = vector.load %arg5[%c0_6, %c0_7] : memref<8x128xf32, #tpu.memory_space<vmem>>, vector<8x128xf32>
    tpu.vector_store %arg5[%c0_6, %c0_7], %12 {strides = array<i32>} : memref<8x128xf32, #tpu.memory_space<vmem>>, vector<8x128xf32>,
    %c0_i32_8 = arith.constant 0 : i32
    %14 = arith.cmpi eq, %arg1, %c0_i32_8 : i32
    %15 = arith.extui %14 : i1 to i32
    %c0_i32_9 = arith.constant 0 : i32
    %16 = arith.cmpi ne, %15, %c0_i32_9 : i32
    scf.if %16 {
      %c0_10 = arith.constant 0 : index
      %c0_11 = arith.constant 0 : index
      %17 = vector.load %arg5[%c0_10, %c0_11] : memref<8x128xf32, #tpu.memory_space<vmem>>, vector<8x128xf32>
      %cst_12 = arith.constant dense<0.000000e+00> : vector<128xf32>
      %18 = vector.multi_reduction <add>, %17, %cst_12 [0] : vector<8x128xf32> to vector<128xf32>
      %19 = vector.shape_cast %18 : vector<128xf32> to vector<1x128xf32>
      %c0_13 = arith.constant 0 : index
      %c0_14 = arith.constant 0 : index
      %20 = vector.load %arg4[%c0_13, %c0_14] : memref<1x128xf32, #tpu.memory_space<vmem>>, vector<1x128xf32>
      tpu.vector_store %arg4[%c0_13, %c0_14], %19 {strides = array<i32>} : memref<1x128xf32, #tpu.memory_space<vmem>>, vector<1x128xf32>,
    } else {
    }
    return
  }
  func.func @transform_0(%arg0: i32, %arg1: i32) -> (i32, i32) {
    %c1_i32 = arith.constant 1 : i32
    %0 = arith.muli %arg0, %c1_i32 : i32
    %1 = arith.addi %0, %arg1 : i32
    %c0_i32 = arith.constant 0 : i32
    %2 = arith.minsi %1, %c0_i32 : i32
    %c0_i32_0 = arith.constant 0 : i32
    %c0_i32_1 = arith.constant 0 : i32
    return %2, %c0_i32_0 : i32, i32
  }
  func.func @transform_1(%arg0: i32, %arg1: i32) -> (i32, i32) {
    %c1_i32 = arith.constant 1 : i32
    %0 = arith.muli %arg0, %c1_i32 : i32
    %1 = arith.addi %0, %arg1 : i32
    %c0_i32 = arith.constant 0 : i32
    %2 = arith.minsi %1, %c0_i32 : i32
    %c0_i32_0 = arith.constant 0 : i32
    %c0_i32_1 = arith.constant 0 : i32
    return %2, %c0_i32_0 : i32, i32
  }
  func.func @transform_2(%arg0: i32, %arg1: i32) -> (i32, i32) {
    %c0_i32 = arith.constant 0 : i32
    %c0_i32_0 = arith.constant 0 : i32
    return %c0_i32, %arg0 : i32, i32
  }
}

</mosaic_0001>

<bundles_post_ra>
// kernel: tpu_custom_call.1
= control target key start
LH: loop header
LB: loop body
LE: loop exit
PB: predicated region body
PF: predicated region fallthrough
CT: control target
= control target key end

     0   :  { %7 = vsyncpa [#allocation4], 0  ;;  %s276_s0 = inlined_call_operand.hbm [shape: f32[16,128], index: 0, kind: input, shape index: {}]   ;;  %s277_s1 = inlined_call_operand.hbm [shape: f32[16,128], index: 1, kind: input, shape index: {}]   ;;  %s278_s2 = inlined_call_operand.hbm [shape: f32[1,128], index: 2, kind: output, shape index: {}]  }
   0x1   :  { %8 = vsyncpa [#allocation7], 0 }
   0x2   :  { %9 = vsyncpa [#allocation5], 0  ;;  %s20_s11 = sshll.u32 %s276_s0, 4  ;;  %s241_s12 = smov [#allocation3]   ;;  %s21_s11 = int_to_ptr.hbm [resolvable:$true] %s20_s11 }
   0x3   :  { %s22_s13 = sshll.u32 %s241_s12, 4  ;;  %s39_s16 = sshll.u32 %s277_s1, 4  ;;  %s23_s13 = int_to_ptr.vmem [resolvable:$true] %s22_s13  ;;  %s40_s16 = int_to_ptr.hbm [resolvable:$true] %s39_s16 }
   0x4   :  { %s242_s17 = smov 128   ;;  %s243_s18 = smov 8  }
   0x5   :  { %28 = dma.hbm_to_vmem [thread:$0]  %s21_s11, 256, %s23_s13, [#allocation4], %s242_s17, %s242_s17, %s243_s18  }
   0x6   :  { %s244_s19 = smov [#allocation6]  }
   0x7   :  { %s41_s20 = sshll.u32 %s244_s19, 4  ;;  %s42_s20 = int_to_ptr.vmem [resolvable:$true] %s41_s20 }
   0x8   :  { %47 = dma.hbm_to_vmem [thread:$0]  %s40_s16, 256, %s42_s20, [#allocation7], %s242_s17, %s242_s17, %s243_s18  }
   0x9   :  { %235 = dma.done.wait [#allocation4], 256  }
   0xa   :  { %236 = vsyncadd [#allocation4], 4294967040 }
   0xb   :  { %237 = dma.done.wait [#allocation7], 256  }
   0xc   :  { %238 = vsyncadd [#allocation7], 4294967040  ;;  %v69_v0 = vld [vmem:[#allocation3] sm:$0xff]  ;;  %v70_v1 = vld [vmem:[#allocation3 + $0x8] sm:$0xff]  ;;  %s245_s0 = smov [#allocation8]   ;;  %s135_s23 = sshll.u32 %s278_s2, 4  ;;  %s136_s23 = int_to_ptr.hbm [resolvable:$true] %s135_s23 }
   0xd   :  { %v71_v2 = vld [vmem:[#allocation6] sm:$0xff]  ;;  %v73_v3 = vadd.f32 1.0, %v69_v0  ;;  %v76_v4 = vmul.f32 -0.5, %v69_v0  ;;  %v82_v5 = vadd.f32 1.0, %v70_v1  ;;  %v72_v6 = vld [vmem:[#allocation6 + $0x8] sm:$0xff]  ;;  %v85_v7 = vmul.f32 -0.5, %v70_v1 }
   0xe   :  { %v91_v8 = vadd.f32 1.0, %v71_v2  ;;  %v94_v9 = vmul.f32 -0.5, %v71_v2  ;;  %v79_v11 = vand.u32 2147483647, %v69_v0  ;;  %v100_v12 = vadd.f32 1.0, %v72_v6  ;;  %s133_s1 = sshll.u32 %s245_s0, 4  ;;  %s134_s1 = int_to_ptr.vmem [resolvable:$true] %s133_s1 }
   0xf   :  { %155 = vlog2.f32 %v73_v3  ;;  %v77_v10 = vadd.f32 1.0, %v76_v4  ;;  %v86_v13 = vadd.f32 1.0, %v85_v7  ;;  %v103_v15 = vmul.f32 -0.5, %v72_v6 }
  0x10   :  { %157 = vlog2.f32 %v82_v5  ;;  %v95_v14 = vadd.f32 1.0, %v94_v9  ;;  %v88_v16 = vand.u32 2147483647, %v70_v1  ;;  %v97_v17 = vand.u32 2147483647, %v71_v2 }
  0x11   :  { %159 = vlog2.f32 %v91_v8  ;;  %v78_v18 = vmul.f32 %v77_v10, %v69_v0  ;;  %v104_v19 = vadd.f32 1.0, %v103_v15  ;;  %vm267_vm0 = vcmp.lt.f32.partialorder %v79_v11, 0.0004427343 }
  0x12   :  { %161 = vlog2.f32 %v100_v12  ;;  %v106_v22 = vand.u32 2147483647, %v72_v6  ;;  %v87_v25 = vmul.f32 %v86_v13, %v70_v1  ;;  %v96_v26 = vmul.f32 %v95_v14, %v71_v2 }
  0x13   :  { %vm89_vm1 = vcmp.lt.f32.partialorder %v88_v16, 0.0004427343  ;;  %vm98_vm2 = vcmp.lt.f32.partialorder %v97_v17, 0.0004427343  ;;  %v105_v31 = vmul.f32 %v104_v19, %v72_v6 }
  0x14   :  { %vm107_vm3 = vcmp.lt.f32.partialorder %v106_v22, 0.0004427343 }
  0x15   :  { %v156_v20 = vpop.eup %155 }
  0x16   :  { %v158_v23 = vpop.eup %157  ;;  %v75_v24 = vmul.f32 0.6931472, %v156_v20 }
  0x17   :  { %v160_v27 = vpop.eup %159  ;;  %v84_v28 = vmul.f32 0.6931472, %v158_v23 }
  0x18   :  { %v81_v29 = vsel %vm267_vm0, %v78_v18, %v75_v24  ;;  %v93_v30 = vmul.f32 0.6931472, %v160_v27  ;;  %v162_v32 = vpop.eup %161 }
  0x19   :  { %v90_v33 = vsel %vm89_vm1, %v87_v25, %v84_v28  ;;  %v102_v35 = vmul.f32 0.6931472, %v162_v32 }
  0x1a   :  { %v99_v34 = vsel %vm98_vm2, %v96_v26, %v93_v30 }
  0x1b   :  { %v109_v36 = vsub.f32 %v81_v29, %v99_v34  ;;  %v108_v37 = vsel %vm107_vm3, %v105_v31, %v102_v35 }
  0x1c   :  { %v110_v38 = vsub.f32 %v90_v33, %v108_v37 }
  0x1d   :  { %v111_v39 = vmul.f32 %v109_v36, %v109_v36 }
  0x1e   :  { %v112_v40 = vmul.f32 %v110_v38, %v110_v38 }
  0x20   :  { %v114_v41 = vadd.f32 %v112_v40, %v111_v39 }
  0x22   :  { %v121_v42 = vrot.slane %v114_v41, 4 }
  0x24   :  { %v122_v43 = vadd.f32 %v121_v42, %v114_v41 }
  0x26   :  { %v123_v44 = vrot.slane %v122_v43, 2 }
  0x28   :  { %v124_v45 = vadd.f32 %v123_v44, %v122_v43 }
  0x2a   :  { %v125_v46 = vrot.slane %v124_v45, 1 }
  0x2c   :  { %v126_v47 = vadd.f32 %v125_v46, %v124_v45 }
  0x2e   :  { %127 = vst [vmem:[#allocation8] sm:$0x1] %v126_v47 }
  0x2f   :  { %138 = dma.vmem_to_hbm [thread:$0]  %s134_s1, 16, %s136_s23, [#allocation5]  }
  0x30   :  { %239 = dma.done.wait [#allocation5], 16  }
  0x31   :  { %240 = vsyncadd [#allocation5], 4294967280 }
  0x32   :  { %143 = vsyncpa [#allocation4], 1 }
  0x33   :  { %144 = vsyncpa [#allocation7], 1 }
  0x34   :  { %145 = vsyncpa [#allocation5], 1 }

</bundles_post_ra>
